<compile_context>
chip_gen: v7x
topology: tpu7x:2x2x1
jax: 0.10.0
libtpu: 0.0.40
codegen_flags: <defaults>
</compile_context>

<pallas_src>
import functools

import jax
import jax.numpy as jnp
from jax import lax
from jax.experimental import pallas as pl
from jax.experimental.pallas import tpu as pltpu
import numpy as np


def _round_up(v: int, m: int) -> int:
    return (v + m - 1) // m * m


def _tpu_vmem_and_layout():
    """Best-effort per-core VMEM bytes, TensorCores/chip, 256-wide-MXU flag."""
    vmem_bytes = 128 * 1024 * 1024
    n_cores = 1
    mxu_256 = False
    kind = ""
    try:
        kind = jax.devices()[0].device_kind.lower()
    except Exception:
        pass
    if "v7" in kind:
        vmem_bytes, n_cores, mxu_256 = 64 * 1024 * 1024, 2, True
    elif "v6" in kind:
        vmem_bytes, n_cores, mxu_256 = 128 * 1024 * 1024, 1, True
    elif ("v5p" in kind) or ("v4" in kind) or ("v3" in kind):
        n_cores = 2  # megacore parts
    try:  # prefer the authoritative number when the query API is available
        info = pltpu.get_tpu_info()
        vmem_bytes = int(getattr(info, "vmem_capacity_bytes", vmem_bytes))
    except Exception:
        pass
    return vmem_bytes, n_cores, mxu_256


# ---------------------------------------------------------------------------
# Kernels
# ---------------------------------------------------------------------------
def _reach_kernel_resident(coeffs_ref, ops_ref, x_ref, out_ref, *, cast_monome):
    """One invocation per d-tile; the whole k-recurrence runs in-kernel.

    coeffs_ref : SMEM [S, K+1]             float32
    ops_ref    : VMEM [K, n_pad, n_pad]    op dtype (whole array, single copy)
    x_ref      : VMEM [n_pad, d_tile]      float32
    out_ref    : VMEM [S, n_pad, d_tile]   float32
    """
    S = out_ref.shape[0]
    K = ops_ref.shape[0]
    op_dtype = ops_ref.dtype

    def op_dot(op, m):
        if cast_monome:
            return jnp.dot(op, m.astype(op_dtype), preferred_element_type=jnp.float32)
        return jnp.dot(op.astype(jnp.float32), m, preferred_element_type=jnp.float32)

    x = x_ref[...]
    # k = 0 peeled: fuse the coeffs[:,0]*x init with the first accumulate, so
    # there is one store pass instead of an init store + read-modify-write.
    m1 = op_dot(ops_ref[0], x)
    for s in range(S):  # S is small and static
        out_ref[s] = (coeffs_ref[s, 0] * x + coeffs_ref[s, 1] * m1).astype(out_ref.dtype)

    def body(k, monome):
        mk = op_dot(ops_ref[k], monome)
        for s in range(S):
            out_ref[s] = out_ref[s] + (coeffs_ref[s, k + 1] * mk).astype(out_ref.dtype)
        return mk

    if K > 1:
        # fori_loop bounds live ranges; fully unroll only for small K.
        lax.fori_loop(1, K, body, m1, unroll=(K <= 8))


def _reach_kernel_stream(coeffs_ref, op_ref, x_ref, out_ref, monome_ref, *, cast_monome):
    """Streaming path: grid=(d_tiles, K); one operator slice per grid step.

    coeffs_ref : SMEM [S, K+1]             float32
    op_ref     : VMEM [1, n_pad, n_pad]    op dtype (slice k, double-buffered)
    x_ref      : VMEM [n_pad, d_tile]      float32
    out_ref    : VMEM [S, n_pad, d_tile]   float32 (resident across k)
    monome_ref : VMEM [n_pad, d_tile]      recurrence state (scratch)
    """
    S = out_ref.shape[0]
    k = pl.program_id(1)
    op_dtype = op_ref.dtype

    def op_dot(m):
        op = op_ref[0]
        if cast_monome:
            return jnp.dot(op, m.astype(op_dtype), preferred_element_type=jnp.float32)
        return jnp.dot(op.astype(jnp.float32), m.astype(jnp.float32),
                       preferred_element_type=jnp.float32)

    @pl.when(k == 0)
    def _():
        x = x_ref[...]
        m1 = op_dot(x)
        for s in range(S):
            out_ref[s] = (coeffs_ref[s, 0] * x
                          + coeffs_ref[s, 1] * m1).astype(out_ref.dtype)
        monome_ref[...] = m1.astype(monome_ref.dtype)

    @pl.when(k > 0)
    def _():
        mk = op_dot(monome_ref[...])
        for s in range(S):
            out_ref[s] = out_ref[s] + (coeffs_ref[s, k + 1] * mk).astype(out_ref.dtype)
        monome_ref[...] = mk.astype(monome_ref.dtype)


# ---------------------------------------------------------------------------
# Wrapper
# ---------------------------------------------------------------------------
def reachability_times_x(ops: jax.Array, x: jax.Array, coeffs: jax.Array, *,
                         op_dtype=jnp.bfloat16, cast_monome: bool = True,
                         force_stream=None) -> jax.Array:
    """ops: [K, n, n], x: [n, d], coeffs: [S, K+1]  ->  out: [S, n, d].

    cast_monome=True  : carried monome is cast to op_dtype every step (fast,
                        bf16 MXU path; rounding compounds over K).
    cast_monome=False : recurrence state stays f32; operators are upcast at
                        the matmul (exact recurrence, slower MXU rate).
    force_stream      : None = auto (size-based), True/False = override.
    """
    K, n, _ = ops.shape
    d = x.shape[1]
    S = coeffs.shape[0]

    coeffs = coeffs.astype(jnp.float32)
    x = x.astype(jnp.float32)

    if K == 0:
        # Empty walk sequence: out[s] = coeffs[s, 0] * x (no kernel needed).
        return coeffs[:, 0][:, None, None] * x[None]

    vmem_phys, n_cores, mxu_256 = _tpu_vmem_and_layout()
    vmem_budget = int(0.85 * vmem_phys)  # headroom for compiler-internal scratch

    # Node axis padding: lane/sublane-dense multiple of 128; 256 on 256-wide
    # MXU parts (v6e/v7x) only when n already exceeds one MXU tile.
    n_align = 256 if (mxu_256 and n > 128) else 128
    n_pad = _round_up(n, n_align)

    op_bytes = jnp.dtype(op_dtype).itemsize
    mono_bytes = op_bytes if cast_monome else 4
    ops_resident_bytes = K * n_pad * n_pad * op_bytes

    # --- path selection ----------------------------------------------------
    if force_stream is None:
        stream = ops_resident_bytes > 0.4 * vmem_budget
    else:
        stream = bool(force_stream)

    # --- d-tile selection (footprint-driven, lane-dense) --------------------
    d_pad128 = _round_up(d, 128)
    d_tile = min(d_pad128, 512)
    if n_cores >= 2 and d_pad128 >= 256:
        # Guarantee >= 2 d-tiles so the "parallel" axis can shard across TCs.
        d_tile = min(d_tile, max(128, _round_up(d_pad128 // 2, 128)))

    def footprint(dt: int, streaming: bool) -> int:
        ops_foot = 2 * n_pad * n_pad * op_bytes if streaming else ops_resident_bytes
        return int(ops_foot
                   + 2 * n_pad * dt * 4            # x tile, double-buffered
                   + 2 * S * n_pad * dt * 4        # out tile, double-buffered
                   + (n_pad * dt * mono_bytes if streaming else 0)  # monome scratch
                   + 3 * n_pad * dt * 4)           # in-kernel temporaries

    while d_tile > 128 and footprint(d_tile, stream) > vmem_budget:
        d_tile = max(128, _round_up(d_tile // 2, 128))
    if (not stream) and footprint(d_tile, stream) > vmem_budget:
        stream = True                               # resident stack too big: stream
        while d_tile > 128 and footprint(d_tile, True) > vmem_budget:
            d_tile = max(128, _round_up(d_tile // 2, 128))

    d_pad = _round_up(d, d_tile)
    num_d_tiles = d_pad // d_tile

    ops_p = jnp.pad(ops.astype(op_dtype),
                    ((0, 0), (0, n_pad - n), (0, n_pad - n)))
    x_p = jnp.pad(x, ((0, n_pad - n), (0, d_pad - d)))

    vmem_limit = int(min(max(2 * footprint(d_tile, stream), 32 * 1024 * 1024),
                         vmem_budget))

    ops_hbm_bytes = ops_resident_bytes * (num_d_tiles if stream else 1)
    cost = pl.CostEstimate(
        flops=int(2 * K * n_pad * n_pad * d_pad + 2 * S * (K + 1) * n_pad * d_pad),
        transcendentals=0,
        bytes_accessed=int(ops_hbm_bytes + n_pad * d_pad * 4
                           + S * n_pad * d_pad * 4 + S * (K + 1) * 4),
    )

    if stream:
        kernel = functools.partial(_reach_kernel_stream, cast_monome=cast_monome)
        grid = (num_d_tiles, K)
        in_specs = [
            pl.BlockSpec(memory_space=pltpu.MemorySpace.SMEM),              # coeffs
            pl.BlockSpec((1, n_pad, n_pad), lambda dt, k: (k, 0, 0)),        # Op_k
            pl.BlockSpec((n_pad, d_tile), lambda dt, k: (0, dt)),            # x tile
        ]
        out_specs = pl.BlockSpec((S, n_pad, d_tile), lambda dt, k: (0, 0, dt))
        scratch = [pltpu.VMEM((n_pad, d_tile),
                              op_dtype if cast_monome else jnp.float32)]
        dims = ("parallel", "arbitrary")
    else:
        kernel = functools.partial(_reach_kernel_resident, cast_monome=cast_monome)
        grid = (num_d_tiles,)
        in_specs = [
            pl.BlockSpec(memory_space=pltpu.MemorySpace.SMEM),              # coeffs
            # Whole ops stack resident in VMEM, single copy (no double-buffer
            # since it never changes across the d grid).
            pl.BlockSpec(memory_space=pltpu.MemorySpace.VMEM),               # ops
            pl.BlockSpec((n_pad, d_tile), lambda dt: (0, dt)),               # x tile
        ]
        out_specs = pl.BlockSpec((S, n_pad, d_tile), lambda dt: (0, 0, dt))
        scratch = []
        dims = ("parallel",)

    out_p = pl.pallas_call(
        kernel,
        out_shape=jax.ShapeDtypeStruct((S, n_pad, d_pad), jnp.float32),
        grid_spec=pltpu.PrefetchScalarGridSpec(
            num_scalar_prefetch=0,
            grid=grid,
            in_specs=in_specs,
            out_specs=out_specs,
            scratch_shapes=scratch,
        ),
        compiler_params=pltpu.CompilerParams(
            dimension_semantics=dims,
            vmem_limit_bytes=vmem_limit,
        ),
        cost_estimate=cost,
    )(coeffs, ops_p, x_p)

    # TODO(synk): expose a bf16 output-dtype option (f32 accumulate in a VMEM
    # scratch, single bf16 store) to halve writeback bytes on v5e/v6e.
    # TODO(synk): on v7x an fp8(e4m3) op_dtype path would further halve the
    # operator stream / resident stack; gated on accuracy requirements.
    return out_p[:, :n, :d]


# ---------------------------------------------------------------------------
# Glue: synthetic TorchAdj equivalent (normalized adjacency orientations),
# AdjSeq cycling, and deterministic Taylor coefficients (RWLCoefficientsModel
# stand-in: truncated-Poisson random-walk-length coefficients).
# ---------------------------------------------------------------------------
def _build_orientation_operators(adj: jax.Array) -> dict:
    eps = 1e-9
    a = adj.astype(jnp.float32)
    d_out = jnp.sum(a, axis=1)
    d_in = jnp.sum(a, axis=0)
    inv_out = 1.0 / jnp.maximum(d_out, eps)
    inv_in = 1.0 / jnp.maximum(d_in, eps)
    DA = inv_out[:, None] * a                              # D_out^-1 A (row norm)
    AD = a * inv_in[None, :]                               # A D_in^-1 (col norm)
    DAD = jnp.sqrt(inv_out)[:, None] * a * jnp.sqrt(inv_in)[None, :]
    u = jnp.maximum(a, a.T)                                # symmetrized adjacency
    du = jnp.sum(u, axis=1)
    inv_du = 1.0 / jnp.maximum(du, eps)
    UD = u * inv_du[None, :]
    DUD = jnp.sqrt(inv_du)[:, None] * u * jnp.sqrt(inv_du)[None, :]
    return {
        'O': AD, 'I': DA.T, 'F': DA, 'B': AD.T, 'X': DAD,
        'U': UD, 'C': UD.T, 'S': DUD, 'A': a, 'T': a.T,
    }


def _adj_seq(base: str, order: int) -> str:
    """AdjSeq.sequence(order): cycle the base orientation string to length order."""
    return ''.join(base[i % len(base)] for i in range(order))


def _poisson_coeffs(taus, order: int) -> jax.Array:
    """Deterministic stand-in for RWLCoefficientsModel: truncated Poisson pmf."""
    ks = jnp.arange(order + 1, dtype=jnp.float32)
    log_fact = jnp.cumsum(jnp.log(jnp.maximum(ks, 1.0)))
    taus = jnp.asarray(taus, dtype=jnp.float32)[:, None]
    logc = ks[None, :] * jnp.log(taus) - taus - log_fact[None, :]
    c = jnp.exp(logc)
    return c / jnp.sum(c, axis=1, keepdims=True)           # renormalize truncation


def _reference(ops, x, coeffs):
    monome = x
    out = coeffs[:, 0][:, None, None] * monome[None]
    for k in range(ops.shape[0]):
        monome = ops[k] @ monome
        out = out + coeffs[:, k + 1][:, None, None] * monome[None]
    return out


if __name__ == "__main__":
    key = jax.random.PRNGKey(0)
    k_adj, k_x, k_adj2, k_x2 = jax.random.split(key, 4)

    # --- Case 1: demo size, bf16-streamed operators, resident path ----------
    n, d, order = 64, 128, 4
    adj = (jax.random.uniform(k_adj, (n, n)) < 0.15).astype(jnp.float32)
    adj = adj * (1.0 - jnp.eye(n, dtype=jnp.float32))
    x = jax.random.normal(k_x, (n, d), dtype=jnp.float32)
    coeffs = _poisson_coeffs([1.0, 3.0], order)              # [S=2, order+1]
    seq = _adj_seq("OI", order)
    op_table = _build_orientation_operators(adj)
    ops = jnp.stack([op_table[o] for o in seq], axis=0)       # [K, n, n]

    ref = _reference(ops, x, coeffs)
    out = jax.block_until_ready(
        reachability_times_x(ops, x, coeffs, op_dtype=jnp.bfloat16))
    np.testing.assert_allclose(np.asarray(out), np.asarray(ref),
                               rtol=5e-2, atol=1e-2)

    # --- Case 2: non-aligned n/d, f32 operators (exact path, exercises padding)
    n2, d2, order2 = 50, 96, 3
    adj2 = (jax.random.uniform(k_adj2, (n2, n2)) < 0.2).astype(jnp.float32)
    adj2 = adj2 * (1.0 - jnp.eye(n2, dtype=jnp.float32))
    x2 = jax.random.normal(k_x2, (n2, d2), dtype=jnp.float32)
    coeffs2 = _poisson_coeffs([2.0], order2)                  # [S=1, order2+1]
    seq2 = _adj_seq("XS", order2)
    ops2 = jnp.stack(
        [_build_orientation_operators(adj2)[o] for o in seq2], axis=0)

    out2 = jax.block_until_ready(
        reachability_times_x(ops2, x2, coeffs2, op_dtype=jnp.float32))
    ref2 = _reference(ops2, x2, coeffs2)
    np.testing.assert_allclose(np.asarray(out2), np.asarray(ref2),
                               rtol=1e-4, atol=1e-5)

    # --- Case 3: force the per-k streaming path (large-stack fallback) ------
    out3 = jax.block_until_ready(
        reachability_times_x(ops, x, coeffs, op_dtype=jnp.bfloat16,
                             force_stream=True))
    np.testing.assert_allclose(np.asarray(out3), np.asarray(ref),
                               rtol=5e-2, atol=1e-2)

    # TODO(synk): ew_filter (optional FilterModel post-processing) is None here;
    # it is not part of the reachability hot path.
    print("KERNEL_OK")
</pallas_src>

<mosaic_0001>
module attributes {stable_mosaic.version = 11 : i64} {
  func.func @_reach_kernel_resident(%arg0: i32, %arg1: memref<2x5xf32, #tpu.memory_space<smem>>, %arg2: memref<4x128x128xbf16, #tpu.memory_space<vmem>>, %arg3: memref<128x128xf32, #tpu.memory_space<vmem>>, %arg4: memref<2x128x128xf32, #tpu.memory_space<vmem>>) attributes {dimension_semantics = [#tpu.dimension_semantics<parallel>], iteration_bounds = array<i64: 1>, scalar_prefetch = 0 : i64, scratch_operands = 0 : i64, tpu.core_type = #tpu.core_type<tc>, window_params = [{transform_indices = @transform_0, window_bounds = array<i64: 2, 5>}, {pipeline_mode = #tpu.pipeline_mode<synchronous>, transform_indices = @transform_1, window_bounds = array<i64: 4, 128, 128>}, {transform_indices = @transform_2, window_bounds = array<i64: 128, 128>}, {transform_indices = @transform_3, window_bounds = array<i64: 2, 128, 128>}]} {
    %c0 = arith.constant 0 : index
    %c0_0 = arith.constant 0 : index
    %0 = vector.load %arg3[%c0, %c0_0] : memref<128x128xf32, #tpu.memory_space<vmem>>, vector<128x128xf32>
    %c0_1 = arith.constant 0 : index
    %c0_2 = arith.constant 0 : index
    %c0_3 = arith.constant 0 : index
    %1 = vector.load %arg2[%c0_1, %c0_2, %c0_3] : memref<4x128x128xbf16, #tpu.memory_space<vmem>>, vector<1x128x128xbf16>
    %2 = vector.shape_cast %1 : vector<1x128x128xbf16> to vector<128x128xbf16>
    %3 = arith.truncf %0 : vector<128x128xf32> to vector<128x128xbf16>
    %cst = arith.constant dense<0.000000e+00> : vector<128x128xf32>
    %4 = tpu.matmul %2, %3, %cst {dimension_numbers = #tpu.dot_dimension_numbers<[1], [0], [0], [1], [0, 0, 1, 1], [], []>} : vector<128x128xbf16>, vector<128x128xbf16>, vector<128x128xf32> -> vector<128x128xf32>
    %c0_4 = arith.constant 0 : index
    %c0_5 = arith.constant 0 : index
    %5 = memref.load %arg1[%c0_4, %c0_5] : memref<2x5xf32, #tpu.memory_space<smem>>
    %6 = vector.broadcast %5 : f32 to vector<128x128xf32>
    %7 = arith.mulf %6, %0 : vector<128x128xf32>
    %c0_6 = arith.constant 0 : index
    %c1 = arith.constant 1 : index
    %8 = memref.load %arg1[%c0_6, %c1] : memref<2x5xf32, #tpu.memory_space<smem>>
    %9 = vector.broadcast %8 : f32 to vector<128x128xf32>
    %10 = arith.mulf %9, %4 : vector<128x128xf32>
    %11 = arith.addf %7, %10 : vector<128x128xf32>
    %c0_7 = arith.constant 0 : index
    %c0_8 = arith.constant 0 : index
    %c0_9 = arith.constant 0 : index
    %12 = vector.load %arg4[%c0_7, %c0_8, %c0_9] : memref<2x128x128xf32, #tpu.memory_space<vmem>>, vector<1x128x128xf32>
    %13 = vector.shape_cast %12 : vector<1x128x128xf32> to vector<128x128xf32>
    %14 = vector.shape_cast %11 : vector<128x128xf32> to vector<1x128x128xf32>
    tpu.vector_store %arg4[%c0_7, %c0_8, %c0_9], %14 {strides = array<i32>} : memref<2x128x128xf32, #tpu.memory_space<vmem>>, vector<1x128x128xf32>,
    %c1_10 = arith.constant 1 : index
    %c0_11 = arith.constant 0 : index
    %15 = memref.load %arg1[%c1_10, %c0_11] : memref<2x5xf32, #tpu.memory_space<smem>>
    %16 = vector.broadcast %15 : f32 to vector<128x128xf32>
    %17 = arith.mulf %16, %0 : vector<128x128xf32>
    %c1_12 = arith.constant 1 : index
    %c1_13 = arith.constant 1 : index
    %18 = memref.load %arg1[%c1_12, %c1_13] : memref<2x5xf32, #tpu.memory_space<smem>>
    %19 = vector.broadcast %18 : f32 to vector<128x128xf32>
    %20 = arith.mulf %19, %4 : vector<128x128xf32>
    %21 = arith.addf %17, %20 : vector<128x128xf32>
    %c1_14 = arith.constant 1 : index
    %c0_15 = arith.constant 0 : index
    %c0_16 = arith.constant 0 : index
    %22 = vector.load %arg4[%c1_14, %c0_15, %c0_16] : memref<2x128x128xf32, #tpu.memory_space<vmem>>, vector<1x128x128xf32>
    %23 = vector.shape_cast %22 : vector<1x128x128xf32> to vector<128x128xf32>
    %24 = vector.shape_cast %21 : vector<128x128xf32> to vector<1x128x128xf32>
    tpu.vector_store %arg4[%c1_14, %c0_15, %c0_16], %24 {strides = array<i32>} : memref<2x128x128xf32, #tpu.memory_space<vmem>>, vector<1x128x128xf32>,
    %c1_i32 = arith.constant 1 : i32
    %25 = arith.index_cast %c1_i32 : i32 to index
    %c0_17 = arith.constant 0 : index
    %c0_18 = arith.constant 0 : index
    %26 = vector.load %arg2[%25, %c0_17, %c0_18] : memref<4x128x128xbf16, #tpu.memory_space<vmem>>, vector<1x128x128xbf16>
    %27 = vector.shape_cast %26 : vector<1x128x128xbf16> to vector<128x128xbf16>
    %28 = arith.truncf %4 : vector<128x128xf32> to vector<128x128xbf16>
    %cst_19 = arith.constant dense<0.000000e+00> : vector<128x128xf32>
    %29 = tpu.matmul %27, %28, %cst_19 {dimension_numbers = #tpu.dot_dimension_numbers<[1], [0], [0], [1], [0, 0, 1, 1], [], []>} : vector<128x128xbf16>, vector<128x128xbf16>, vector<128x128xf32> -> vector<128x128xf32>
    %c0_20 = arith.constant 0 : index
    %c0_21 = arith.constant 0 : index
    %c0_22 = arith.constant 0 : index
    %30 = vector.load %arg4[%c0_20, %c0_21, %c0_22] : memref<2x128x128xf32, #tpu.memory_space<vmem>>, vector<1x128x128xf32>
    %31 = vector.shape_cast %30 : vector<1x128x128xf32> to vector<128x128xf32>
    %c1_i32_23 = arith.constant 1 : i32
    %32 = arith.addi %c1_i32, %c1_i32_23 : i32
    %c0_24 = arith.constant 0 : index
    %33 = arith.index_cast %32 : i32 to index
    %34 = memref.load %arg1[%c0_24, %33] : memref<2x5xf32, #tpu.memory_space<smem>>
    %35 = vector.broadcast %34 : f32 to vector<128x128xf32>
    %36 = arith.mulf %35, %29 : vector<128x128xf32>
    %37 = arith.addf %31, %36 : vector<128x128xf32>
    %c0_25 = arith.constant 0 : index
    %c0_26 = arith.constant 0 : index
    %c0_27 = arith.constant 0 : index
    %38 = vector.load %arg4[%c0_25, %c0_26, %c0_27] : memref<2x128x128xf32, #tpu.memory_space<vmem>>, vector<1x128x128xf32>
    %39 = vector.shape_cast %38 : vector<1x128x128xf32> to vector<128x128xf32>
    %40 = vector.shape_cast %37 : vector<128x128xf32> to vector<1x128x128xf32>
    tpu.vector_store %arg4[%c0_25, %c0_26, %c0_27], %40 {strides = array<i32>} : memref<2x128x128xf32, #tpu.memory_space<vmem>>, vector<1x128x128xf32>,
    %c1_28 = arith.constant 1 : index
    %c0_29 = arith.constant 0 : index
    %c0_30 = arith.constant 0 : index
    %41 = vector.load %arg4[%c1_28, %c0_29, %c0_30] : memref<2x128x128xf32, #tpu.memory_space<vmem>>, vector<1x128x128xf32>
    %42 = vector.shape_cast %41 : vector<1x128x128xf32> to vector<128x128xf32>
    %c1_i32_31 = arith.constant 1 : i32
    %43 = arith.addi %c1_i32, %c1_i32_31 : i32
    %c1_32 = arith.constant 1 : index
    %44 = arith.index_cast %43 : i32 to index
    %45 = memref.load %arg1[%c1_32, %44] : memref<2x5xf32, #tpu.memory_space<smem>>
    %46 = vector.broadcast %45 : f32 to vector<128x128xf32>
    %47 = arith.mulf %46, %29 : vector<128x128xf32>
    %48 = arith.addf %42, %47 : vector<128x128xf32>
    %c1_33 = arith.constant 1 : index
    %c0_34 = arith.constant 0 : index
    %c0_35 = arith.constant 0 : index
    %49 = vector.load %arg4[%c1_33, %c0_34, %c0_35] : memref<2x128x128xf32, #tpu.memory_space<vmem>>, vector<1x128x128xf32>
    %50 = vector.shape_cast %49 : vector<1x128x128xf32> to vector<128x128xf32>
    %51 = vector.shape_cast %48 : vector<128x128xf32> to vector<1x128x128xf32>
    tpu.vector_store %arg4[%c1_33, %c0_34, %c0_35], %51 {strides = array<i32>} : memref<2x128x128xf32, #tpu.memory_space<vmem>>, vector<1x128x128xf32>,
    %c2_i32 = arith.constant 2 : i32
    %52 = arith.index_cast %c2_i32 : i32 to index
    %c0_36 = arith.constant 0 : index
    %c0_37 = arith.constant 0 : index
    %53 = vector.load %arg2[%52, %c0_36, %c0_37] : memref<4x128x128xbf16, #tpu.memory_space<vmem>>, vector<1x128x128xbf16>
    %54 = vector.shape_cast %53 : vector<1x128x128xbf16> to vector<128x128xbf16>
    %55 = arith.truncf %29 : vector<128x128xf32> to vector<128x128xbf16>
    %cst_38 = arith.constant dense<0.000000e+00> : vector<128x128xf32>
    %56 = tpu.matmul %54, %55, %cst_38 {dimension_numbers = #tpu.dot_dimension_numbers<[1], [0], [0], [1], [0, 0, 1, 1], [], []>} : vector<128x128xbf16>, vector<128x128xbf16>, vector<128x128xf32> -> vector<128x128xf32>
    %c0_39 = arith.constant 0 : index
    %c0_40 = arith.constant 0 : index
    %c0_41 = arith.constant 0 : index
    %57 = vector.load %arg4[%c0_39, %c0_40, %c0_41] : memref<2x128x128xf32, #tpu.memory_space<vmem>>, vector<1x128x128xf32>
    %58 = vector.shape_cast %57 : vector<1x128x128xf32> to vector<128x128xf32>
    %c1_i32_42 = arith.constant 1 : i32
    %59 = arith.addi %c2_i32, %c1_i32_42 : i32
    %c0_43 = arith.constant 0 : index
    %60 = arith.index_cast %59 : i32 to index
    %61 = memref.load %arg1[%c0_43, %60] : memref<2x5xf32, #tpu.memory_space<smem>>
    %62 = vector.broadcast %61 : f32 to vector<128x128xf32>
    %63 = arith.mulf %62, %56 : vector<128x128xf32>
    %64 = arith.addf %58, %63 : vector<128x128xf32>
    %c0_44 = arith.constant 0 : index
    %c0_45 = arith.constant 0 : index
    %c0_46 = arith.constant 0 : index
    %65 = vector.load %arg4[%c0_44, %c0_45, %c0_46] : memref<2x128x128xf32, #tpu.memory_space<vmem>>, vector<1x128x128xf32>
    %66 = vector.shape_cast %65 : vector<1x128x128xf32> to vector<128x128xf32>
    %67 = vector.shape_cast %64 : vector<128x128xf32> to vector<1x128x128xf32>
    tpu.vector_store %arg4[%c0_44, %c0_45, %c0_46], %67 {strides = array<i32>} : memref<2x128x128xf32, #tpu.memory_space<vmem>>, vector<1x128x128xf32>,
    %c1_47 = arith.constant 1 : index
    %c0_48 = arith.constant 0 : index
    %c0_49 = arith.constant 0 : index
    %68 = vector.load %arg4[%c1_47, %c0_48, %c0_49] : memref<2x128x128xf32, #tpu.memory_space<vmem>>, vector<1x128x128xf32>
    %69 = vector.shape_cast %68 : vector<1x128x128xf32> to vector<128x128xf32>
    %c1_i32_50 = arith.constant 1 : i32
    %70 = arith.addi %c2_i32, %c1_i32_50 : i32
    %c1_51 = arith.constant 1 : index
    %71 = arith.index_cast %70 : i32 to index
    %72 = memref.load %arg1[%c1_51, %71] : memref<2x5xf32, #tpu.memory_space<smem>>
    %73 = vector.broadcast %72 : f32 to vector<128x128xf32>
    %74 = arith.mulf %73, %56 : vector<128x128xf32>
    %75 = arith.addf %69, %74 : vector<128x128xf32>
    %c1_52 = arith.constant 1 : index
    %c0_53 = arith.constant 0 : index
    %c0_54 = arith.constant 0 : index
    %76 = vector.load %arg4[%c1_52, %c0_53, %c0_54] : memref<2x128x128xf32, #tpu.memory_space<vmem>>, vector<1x128x128xf32>
    %77 = vector.shape_cast %76 : vector<1x128x128xf32> to vector<128x128xf32>
    %78 = vector.shape_cast %75 : vector<128x128xf32> to vector<1x128x128xf32>
    tpu.vector_store %arg4[%c1_52, %c0_53, %c0_54], %78 {strides = array<i32>} : memref<2x128x128xf32, #tpu.memory_space<vmem>>, vector<1x128x128xf32>,
    %c3_i32 = arith.constant 3 : i32
    %79 = arith.index_cast %c3_i32 : i32 to index
    %c0_55 = arith.constant 0 : index
    %c0_56 = arith.constant 0 : index
    %80 = vector.load %arg2[%79, %c0_55, %c0_56] : memref<4x128x128xbf16, #tpu.memory_space<vmem>>, vector<1x128x128xbf16>
    %81 = vector.shape_cast %80 : vector<1x128x128xbf16> to vector<128x128xbf16>
    %82 = arith.truncf %56 : vector<128x128xf32> to vector<128x128xbf16>
    %cst_57 = arith.constant dense<0.000000e+00> : vector<128x128xf32>
    %83 = tpu.matmul %81, %82, %cst_57 {dimension_numbers = #tpu.dot_dimension_numbers<[1], [0], [0], [1], [0, 0, 1, 1], [], []>} : vector<128x128xbf16>, vector<128x128xbf16>, vector<128x128xf32> -> vector<128x128xf32>
    %c0_58 = arith.constant 0 : index
    %c0_59 = arith.constant 0 : index
    %c0_60 = arith.constant 0 : index
    %84 = vector.load %arg4[%c0_58, %c0_59, %c0_60] : memref<2x128x128xf32, #tpu.memory_space<vmem>>, vector<1x128x128xf32>
    %85 = vector.shape_cast %84 : vector<1x128x128xf32> to vector<128x128xf32>
    %c1_i32_61 = arith.constant 1 : i32
    %86 = arith.addi %c3_i32, %c1_i32_61 : i32
    %c0_62 = arith.constant 0 : index
    %87 = arith.index_cast %86 : i32 to index
    %88 = memref.load %arg1[%c0_62, %87] : memref<2x5xf32, #tpu.memory_space<smem>>
    %89 = vector.broadcast %88 : f32 to vector<128x128xf32>
    %90 = arith.mulf %89, %83 : vector<128x128xf32>
    %91 = arith.addf %85, %90 : vector<128x128xf32>
    %c0_63 = arith.constant 0 : index
    %c0_64 = arith.constant 0 : index
    %c0_65 = arith.constant 0 : index
    %92 = vector.load %arg4[%c0_63, %c0_64, %c0_65] : memref<2x128x128xf32, #tpu.memory_space<vmem>>, vector<1x128x128xf32>
    %93 = vector.shape_cast %92 : vector<1x128x128xf32> to vector<128x128xf32>
    %94 = vector.shape_cast %91 : vector<128x128xf32> to vector<1x128x128xf32>
    tpu.vector_store %arg4[%c0_63, %c0_64, %c0_65], %94 {strides = array<i32>} : memref<2x128x128xf32, #tpu.memory_space<vmem>>, vector<1x128x128xf32>,
    %c1_66 = arith.constant 1 : index
    %c0_67 = arith.constant 0 : index
    %c0_68 = arith.constant 0 : index
    %95 = vector.load %arg4[%c1_66, %c0_67, %c0_68] : memref<2x128x128xf32, #tpu.memory_space<vmem>>, vector<1x128x128xf32>
    %96 = vector.shape_cast %95 : vector<1x128x128xf32> to vector<128x128xf32>
    %c1_i32_69 = arith.constant 1 : i32
    %97 = arith.addi %c3_i32, %c1_i32_69 : i32
    %c1_70 = arith.constant 1 : index
    %98 = arith.index_cast %97 : i32 to index
    %99 = memref.load %arg1[%c1_70, %98] : memref<2x5xf32, #tpu.memory_space<smem>>
    %100 = vector.broadcast %99 : f32 to vector<128x128xf32>
    %101 = arith.mulf %100, %83 : vector<128x128xf32>
    %102 = arith.addf %96, %101 : vector<128x128xf32>
    %c1_71 = arith.constant 1 : index
    %c0_72 = arith.constant 0 : index
    %c0_73 = arith.constant 0 : index
    %103 = vector.load %arg4[%c1_71, %c0_72, %c0_73] : memref<2x128x128xf32, #tpu.memory_space<vmem>>, vector<1x128x128xf32>
    %104 = vector.shape_cast %103 : vector<1x128x128xf32> to vector<128x128xf32>
    %105 = vector.shape_cast %102 : vector<128x128xf32> to vector<1x128x128xf32>
    tpu.vector_store %arg4[%c1_71, %c0_72, %c0_73], %105 {strides = array<i32>} : memref<2x128x128xf32, #tpu.memory_space<vmem>>, vector<1x128x128xf32>,
    %c3_i32_74 = arith.constant 3 : i32
    return
  }
  func.func @transform_0(%arg0: i32) -> (i32, i32) {
    %c0_i32 = arith.constant 0 : i32
    %c0_i32_0 = arith.constant 0 : i32
    %c0_i32_1 = arith.constant 0 : i32
    return %c0_i32, %c0_i32_0 : i32, i32
  }
  func.func @transform_1(%arg0: i32) -> (i32, i32, i32) {
    %c0_i32 = arith.constant 0 : i32
    %c0_i32_0 = arith.constant 0 : i32
    %c0_i32_1 = arith.constant 0 : i32
    %c0_i32_2 = arith.constant 0 : i32
    return %c0_i32, %c0_i32_0, %c0_i32_1 : i32, i32, i32
  }
  func.func @transform_2(%arg0: i32) -> (i32, i32) {
    %c0_i32 = arith.constant 0 : i32
    %c0_i32_0 = arith.constant 0 : i32
    return %c0_i32, %arg0 : i32, i32
  }
  func.func @transform_3(%arg0: i32) -> (i32, i32, i32) {
    %c0_i32 = arith.constant 0 : i32
    %c0_i32_0 = arith.constant 0 : i32
    %c0_i32_1 = arith.constant 0 : i32
    return %c0_i32, %c0_i32_0, %arg0 : i32, i32, i32
  }
}

</mosaic_0001>

<bundles_post_ra>
// kernel: tpu_custom_call.1
= control target key start
LH: loop header
LB: loop body
LE: loop exit
PB: predicated region body
PF: predicated region fallthrough
CT: control target
= control target key end

     0   :  { %8 = vsyncpa [#allocation5], 0  ;;  %s2326_s0 = inlined_call_operand.hbm [shape: f32[2,5], index: 0, kind: input, shape index: {}]   ;;  %s2327_s1 = inlined_call_operand.hbm [shape: bf16[4,128,128], index: 1, kind: input, shape index: {}]   ;;  %s2328_s2 = inlined_call_operand.hbm [shape: f32[128,128], index: 2, kind: input, shape index: {}]   ;;  %s2329_s3 = inlined_call_operand.hbm [shape: f32[2,128,128], index: 3, kind: output, shape index: {}]  }
   0x1   :  { %9 = vsyncpa [#allocation3], 0 }
   0x2   :  { %10 = vsyncpa [#allocation8], 0 }
   0x3   :  { %11 = vsyncpa [#allocation4], 0  ;;  %s1575_s14 = scalar_lea.hbm %s2326_s0, 32 }
   0x4   :  { %p1576_p0 = scmp.ne.s32.totalorder %s2326_s0, %s1575_s14  ;;  %p1579_p1 = scmp.lt.u32.totalorder %s1575_s14, %s2326_s0 }
   0x6   :  { %p1581_p2 = pnand %p1579_p1, %p1576_p0 }
   0x8   :  { %1584 = shalt.err (!%p1581_p2)
}
   0x9   :  { %s1659_s19 = smov [#allocation2]   ;;  %s1660_s22 = smov [#allocation6]  }
   0xa   :  { %19 = dma.hbm_to_smem %s2326_s0, 32, %s1659_s19, [#allocation5]  }
   0xb   :  { %s25_s23 = sshll.u32 %s1660_s22, 4  ;;  %s1585_s26 = scalar_lea.hbm %s2327_s1, 4096  ;;  %s26_s23 = int_to_ptr.vmem [resolvable:$true] %s25_s23 }
   0xc   :  { %p1586_p3 = scmp.ne.s32.totalorder %s2327_s1, %s1585_s26  ;;  %p1589_p4 = scmp.lt.u32.totalorder %s1585_s26, %s2327_s1 }
   0xe   :  { %p1591_p5 = pnand %p1589_p4, %p1586_p3 }
  0x10   :  { %1594 = shalt.err (!%p1591_p5)
}
  0x11   :  { %s1595_s4 = scalar_lea.vmem %s26_s23, 4096  ;;  %p1600_p7 = scmp.lt.s32.totalorder %s26_s23, %s26_s23 }
  0x12   :  { %p1596_p6 = scmp.ne.s32.totalorder %s26_s23, %s1595_s4  ;;  %p1601_p8 = scmp.lt.s32.totalorder %s1595_s4, %s1595_s4 }
  0x14   :  { %p1602_p9 = por %p1601_p8, %p1600_p7 }
  0x16   :  { %p1603_p10 = pnand %p1602_p9, %p1596_p6 }
  0x18   :  { %1606 = shalt.err (!%p1603_p10)
}
  0x19   :  { %s1661_s0 = smov 64   ;;  %s1662_s5 = smov 4  }
  0x1a   :  { %31 = dma.hbm_to_vmem [thread:$0]  %s2327_s1, 4096, %s26_s23, [#allocation3], %s1661_s0, %s1661_s0, %s1662_s5  }
  0x1b   :  { %s1663_s8 = smov [#allocation7]   ;;  %s1607_s12 = scalar_lea.hbm %s2328_s2, 2048 }
  0x1c   :  { %s37_s9 = sshll.u32 %s1663_s8, 4  ;;  %p1608_p11 = scmp.ne.s32.totalorder %s2328_s2, %s1607_s12  ;;  %s38_s9 = int_to_ptr.vmem [resolvable:$true] %s37_s9 }
  0x1d   :  { %p1611_p12 = scmp.lt.u32.totalorder %s1607_s12, %s2328_s2 }
  0x1f   :  { %p1613_p13 = pnand %p1611_p12, %p1608_p11 }
  0x21   :  { %1616 = shalt.err (!%p1613_p13)
}
  0x22   :  { %s1617_s17 = scalar_lea.vmem %s38_s9, 2048  ;;  %p1622_p1 = scmp.lt.s32.totalorder %s38_s9, %s38_s9 }
  0x23   :  { %p1618_p0 = scmp.ne.s32.totalorder %s38_s9, %s1617_s17  ;;  %p1623_p2 = scmp.lt.s32.totalorder %s1617_s17, %s1617_s17 }
  0x25   :  { %p1624_p3 = por %p1623_p2, %p1622_p1 }
  0x27   :  { %p1625_p4 = pnand %p1624_p3, %p1618_p0 }
  0x29   :  { %1628 = shalt.err (!%p1625_p4)
}
  0x2a   :  { %s1664_s1 = smov 128   ;;  %s1665_s18 = smov 8  }
  0x2b   :  { %43 = dma.hbm_to_vmem [thread:$0]  %s2328_s2, 2048, %s38_s9, [#allocation8], %s1664_s1, %s1664_s1, %s1665_s18  }
  0x2c   :  { %1651 = dma.done.wait [#allocation5], 32  }
  0x2d   :  { %1652 = vsyncadd [#allocation5], 4294967264 }
  0x2e   :  { %1653 = dma.done.wait [#allocation3], 4096  }
  0x2f   :  { %1654 = vsyncadd [#allocation3], 4294963200 }
  0x30   :  { %1655 = dma.done.wait [#allocation8], 2048  }
  0x31   :  { %1656 = vsyncadd [#allocation8], 4294965248 }
  0x32   :  { %53 = sfence }
  0x33   :  { %v1726_v0 = vld [vmem:[#allocation7] sm:$0xff]  ;;  %v1728_v1 = vld [vmem:[#allocation7 + $0x8] sm:$0xff]  ;;  %v1732_v3 = vld [vmem:[#allocation7 + $0x10] sm:$0xff]  ;;  %s240_s2 = sld [smem:[#allocation2]]  ;;  %s1310_s22 = sld [smem:[#allocation2 + $0x1]] }
  0x34   :  { %v87_v2 = vpack.c.bf16 %v1728_v1, %v1726_v0  ;;  %v1734_v4 = vld [vmem:[#allocation7 + $0x18] sm:$0xff]  ;;  %v1738_v6 = vld [vmem:[#allocation7 + $0x20] sm:$0xff]  ;;  %v1740_v7 = vld [vmem:[#allocation7 + $0x28] sm:$0xff]  ;;  %s1311_s21 = sld [smem:[#allocation2 + $0x80]]  ;;  %s1312_s23 = sld [smem:[#allocation2 + $0x81]] }
  0x35   :  { %v88_v5 = vpack.c.bf16 %v1734_v4, %v1732_v3  ;;  %v89_v8 = vpack.c.bf16 %v1740_v7, %v1738_v6  ;;  %v1744_v9 = vld [vmem:[#allocation7 + $0x30] sm:$0xff]  ;;  %v1746_v10 = vld [vmem:[#allocation7 + $0x38] sm:$0xff]  ;;  %v1543_v11 = vld [vmem:[#allocation6] sm:$0xff]   ;;  %s1850_s24 = sld [smem:[#allocation2 + $0x2]]  ;;  %s1331_s26 = sld [smem:[#allocation2 + $0x3]] }
  0x36   :  { %1407 = vmatprep.subr.bf16.mxu0 %v87_v2  ;;  %1423 = vmatprep.mubr.bf16.mxu0 %v1543_v11  ;;  %v90_v12 = vpack.c.bf16 %v1746_v10, %v1744_v9  ;;  %v1750_v13 = vld [vmem:[#allocation7 + $0x40] sm:$0xff]  ;;  %v1752_v14 = vld [vmem:[#allocation7 + $0x48] sm:$0xff]  ;;  %v1754_v15 = vld [vmem:[#allocation7 + $0x50] sm:$0xff]  ;;  %s1852_s25 = sld [smem:[#allocation2 + $0x82]]  ;;  %s1332_s27 = sld [smem:[#allocation2 + $0x83]] }
  0x37   :  { %1408 = vmatpush3.bf16.msra.mxu0 %v87_v2  ;;  %v91_v16 = vpack.c.bf16 %v1752_v14, %v1750_v13  ;;  %v1758_v17 = vld [vmem:[#allocation7 + $0x58] sm:$0xff]  ;;  %v1760_v18 = vld [vmem:[#allocation7 + $0x60] sm:$0xff]  ;;  %v1762_v19 = vld [vmem:[#allocation7 + $0x68] sm:$0xff]  ;;  %s1341_s28 = sld [smem:[#allocation2 + $0x4]]  ;;  %s1666_s30 = smov [#allocation9]  }
  0x38   :  { %1409 = vmatprep.subr.bf16.mxu0 %v88_v5  ;;  %v92_v20 = vpack.c.bf16 %v1758_v17, %v1754_v15  ;;  %v1766_v21 = vld [vmem:[#allocation7 + $0x70] sm:$0xff]  ;;  %v1768_v22 = vld [vmem:[#allocation7 + $0x78] sm:$0xff]  ;;  %v93_v23 = vpack.c.bf16 %v1762_v19, %v1760_v18  ;;  %v1544_v25 = vld [vmem:[#allocation6 + $0x8] sm:$0xff]   ;;  %s1342_s29 = sld [smem:[#allocation2 + $0x84]]  ;;  %s1288_s4 = sshll.u32 %s1666_s30, 4  ;;  %s1289_s4 = int_to_ptr.vmem [resolvable:$true] %s1288_s4 }
  0x39   :  { %v94_v24 = vpack.c.bf16 %v1768_v22, %v1766_v21  ;;  %v1545_v26 = vld [vmem:[#allocation6 + $0x10] sm:$0xff]   ;;  %v1546_v27 = vld [vmem:[#allocation6 + $0x18] sm:$0xff]   ;;  %v1547_v28 = vld [vmem:[#allocation6 + $0x20] sm:$0xff]   ;;  %v1774_v33 = vstv %s240_s2  ;;  %v1778_v35 = vstv %s1310_s22  ;;  %s1629_s0 = scalar_lea.vmem %s1289_s4, 4096  ;;  %p1634_p6 = scmp.lt.s32.totalorder %s1289_s4, %s1289_s4 }
  0x3a   :  { %v1548_v29 = vld [vmem:[#allocation6 + $0x28] sm:$0xff]   ;;  %v1549_v30 = vld [vmem:[#allocation6 + $0x30] sm:$0xff]   ;;  %v1550_v31 = vld [vmem:[#allocation6 + $0x38] sm:$0xff]   ;;  %v1776_v34 = vstv %s1311_s21  ;;  %v1780_v36 = vstv %s1312_s23  ;;  %v242_v37 = vmul.f32 %v1774_v33, %v1726_v0  ;;  %v243_v41 = vmul.f32 %v1774_v33, %v1728_v1  ;;  %p1630_p5 = scmp.ne.s32.totalorder %s1289_s4, %s1629_s0  ;;  %p1635_p7 = scmp.lt.s32.totalorder %s1629_s0, %s1629_s0 }
  0x3b   :  { %1410 = vmatpush3.bf16.msra.mxu0 %v88_v5  ;;  %v1551_v32 = vld [vmem:[#allocation6 + $0x40] sm:$0xff]   ;;  %v310_v38 = vmul.f32 %v1776_v34, %v1726_v0  ;;  %v311_v45 = vmul.f32 %v1776_v34, %v1728_v1 }
  0x3c   :  { %1411 = vmatprep.subr.bf16.mxu0 %v89_v8  ;;  %1455 = vmatprep.mubr.bf16.mxu1 %v1551_v32  ;;  %v312_v32 = vmul.f32 %v1776_v34, %v1732_v3  ;;  %p1636_p8 = por %p1635_p7, %p1634_p6 }
  0x3e   :  { %p1637_p9 = pnand %p1636_p8, %p1630_p5 }
  0x3f   :  { %1412 = vmatpush3.bf16.msra.mxu0 %v89_v8 }
  0x40   :  { %1413 = vmatprep.subr.bf16.mxu0 %v90_v12 }
  0x43   :  { %1414 = vmatpush3.bf16.msra.mxu0 %v90_v12 }
  0x44   :  { %1415 = vmatprep.subr.bf16.mxu0 %v91_v16 }
  0x47   :  { %1416 = vmatpush3.bf16.msra.mxu0 %v91_v16 }
  0x48   :  { %1417 = vmatprep.subr.bf16.mxu0 %v92_v20 }
  0x4b   :  { %1418 = vmatpush3.bf16.msra.mxu0 %v92_v20 }
  0x4c   :  { %1419 = vmatprep.subr.bf16.mxu0 %v93_v23 }
  0x4f   :  { %1420 = vmatpush3.bf16.msra.mxu0 %v93_v23  ;;  %v1552_v23 = vld [vmem:[#allocation6 + $0x48] sm:$0xff]  }
  0x50   :  { %1421 = vmatprep.subr.bf16.mxu0 %v94_v24 }
  0x53   :  { %1422 = vmatpush3.bf16.msra.mxu0 %v94_v24  ;;  %v1553_v24 = vld [vmem:[#allocation6 + $0x50] sm:$0xff]  }
  0x56   :  { %1424 = vmatmul.mubr.bf16.vlgmr.msra.gmra.mrb[0].mxu0 %v1544_v25  ;;  %v1554_v25 = vld [vmem:[#allocation6 + $0x58] sm:$0xff]  }
  0x57   :  { %1427 = vmatprep.mubr.bf16.mxu0 %v1545_v26  ;;  %v1555_v26 = vld [vmem:[#allocation6 + $0x60] sm:$0xff]  }
  0x5e   :  { %1428 = vmatmul.mubr.bf16.gmra.mrb[4].mxu0 %v1546_v27  ;;  %v1556_v27 = vld [vmem:[#allocation6 + $0x68] sm:$0xff]  }
  0x5f   :  { %1431 = vmatprep.mubr.bf16.mxu0 %v1547_v28  ;;  %v1557_v28 = vld [vmem:[#allocation6 + $0x70] sm:$0xff]  }
  0x66   :  { %1432 = vmatmul.mubr.bf16.gmra.mrb[8].mxu0 %v1548_v29  ;;  %v1558_v29 = vld [vmem:[#allocation6 + $0x78] sm:$0xff]  }
  0x67   :  { %1435 = vmatprep.mubr.bf16.mxu0 %v1549_v30  ;;  %v1559_v30 = vld [vmem:[#allocation6 + $0x80] sm:$0xff]  }
  0x6e   :  { %1436 = vmatmul.mubr.bf16.gmra.mrb[12].mxu0 %v1550_v31  ;;  %v244_v31 = vmul.f32 %v1774_v33, %v1732_v3  ;;  %v314_v3 = vmul.f32 %v1776_v34, %v1738_v6 }
  0x6f   :  { %1487 = vmatprep.mubr.bf16.mxu0 %v1559_v30 }
 0x129   :  { %v1786_v39 = vpop.f32.mrb[0].mxu0 }
 0x12a   :  { %v177_v40 = vpop.f32.mrb[1].mxu0 }
 0x12b   :  { %v260_v42 = vmul.f32 %v1778_v35, %v177_v40  ;;  %v328_v43 = vmul.f32 %v1780_v36, %v177_v40  ;;  %v1792_v44 = vpop.f32.mrb[2].mxu0 }
 0x12c   :  { %v180_v46 = vpop.f32.mrb[3].mxu0  ;;  %v395_v49 = vpack.c.bf16 %v1792_v44, %v1786_v39 }
 0x12d   :  { %v1796_v47 = vadd.f32 %v260_v42, %v242_v37  ;;  %v1798_v48 = vadd.f32 %v328_v43, %v310_v38  ;;  %v261_v50 = vmul.f32 %v1778_v35, %v180_v46  ;;  %v329_v51 = vmul.f32 %v1780_v36, %v180_v46 }
 0x12e   :  { %v394_v52 = vpack.c.bf16 %v180_v46, %v177_v40  ;;  %v245_v37 = vmul.f32 %v1774_v33, %v1734_v4  ;;  %v313_v38 = vmul.f32 %v1776_v34, %v1734_v4  ;;  %v248_v40 = vmul.f32 %v1774_v33, %v1744_v9 }
 0x12f   :  { %v1804_v53 = vadd.f32 %v261_v50, %v243_v41  ;;  %v1806_v54 = vadd.f32 %v329_v51, %v311_v45  ;;  %v316_v41 = vmul.f32 %v1776_v34, %v1744_v9  ;;  %v246_v42 = vmul.f32 %v1774_v33, %v1738_v6 }
 0x130   :  { %1439 = vmatprep.subr.bf16.mxu1 %v394_v52  ;;  %v249_v43 = vmul.f32 %v1774_v33, %v1746_v10  ;;  %v317_v45 = vmul.f32 %v1776_v34, %v1746_v10  ;;  %v247_v4 = vmul.f32 %v1774_v33, %v1740_v7  ;;  %v315_v46 = vmul.f32 %v1776_v34, %v1740_v7 }
 0x131   :  { %1440 = vmatpush3.bf16.msra.mxu1 %v394_v52  ;;  %v1808_v55 = vpop.f32.mrb[4].mxu0  ;;  %v1874_v9 = vmul.f32 %v1774_v33, %v1754_v15  ;;  %v1882_v6 = vmul.f32 %v1774_v33, %v1750_v13  ;;  %v1886_v10 = vmul.f32 %v1776_v34, %v1750_v13  ;;  %v1890_v50 = vmul.f32 %v1774_v33, %v1758_v17 }
 0x132   :  { %1441 = vmatprep.subr.bf16.mxu1 %v395_v49  ;;  %v1810_v56 = vpop.f32.mrb[5].mxu0  ;;  %v1894_v7 = vmul.f32 %v1776_v34, %v1758_v17  ;;  %v262_v51 = vmul.f32 %v1786_v39, %v1778_v35  ;;  %v330_v13 = vmul.f32 %v1786_v39, %v1780_v36  ;;  %v263_v52 = vmul.f32 %v1792_v44, %v1778_v35 }
 0x133   :  { %v1812_v57 = vpop.f32.mrb[6].mxu0  ;;  %v266_v17 = vmul.f32 %v1808_v55, %v1778_v35  ;;  %v1922_v39 = vmul.f32 %v1776_v34, %v1766_v21 }
 0x134   :  { %v1814_v58 = vpop.f32.mrb[7].mxu0  ;;  %v397_v59 = vpack.c.bf16 %v1812_v57, %v1808_v55 }
 0x135   :  { %1442 = vmatpush3.bf16.msra.mxu1 %v395_v49  ;;  %v396_v60 = vpack.c.bf16 %v1814_v58, %v1810_v56  ;;  %v1878_v49 = vmul.f32 %v1776_v34, %v1754_v15  ;;  %v1898_v15 = vmul.f32 %v1774_v33, %v1752_v14 }
 0x137   :  { %1443 = vmatprep.subr.bf16.mxu1 %v396_v60 }
 0x139   :  { %1444 = vmatpush3.bf16.msra.mxu1 %v396_v60  ;;  %v1820_v61 = vpop.f32.mrb[8].mxu0  ;;  %v334_v60 = vmul.f32 %v1808_v55, %v1780_v36  ;;  %v1938_v55 = vmul.f32 %v1776_v34, %v1768_v22 }
 0x13a   :  { %1445 = vmatprep.subr.bf16.mxu1 %v397_v59  ;;  %v1822_v62 = vpop.f32.mrb[9].mxu0 }
 0x13b   :  { %v1824_v63 = vpop.f32.mrb[10].mxu0  ;;  %2333 = vst [vmem:[#allocation17_spill] sm:$0xff] %v1938_v55 }
 0x13c   :  { %v1826_v0 = vpop.f32.mrb[11].mxu0  ;;  %v399_v1 = vpack.c.bf16 %v1824_v63, %v1820_v61 }
 0x13d   :  { %1446 = vmatpush3.bf16.msra.mxu1 %v397_v59  ;;  %v398_v2 = vpack.c.bf16 %v1826_v0, %v1822_v62  ;;  %v331_v59 = vmul.f32 %v1792_v44, %v1780_v36  ;;  %v1926_v44 = vmul.f32 %v1774_v33, %v1760_v18 }
 0x13f   :  { %1447 = vmatprep.subr.bf16.mxu1 %v398_v2  ;;  %2330 = vst [vmem:[#allocation14_spill] sm:$0xff] %v1926_v44 }
 0x141   :  { %1448 = vmatpush3.bf16.msra.mxu1 %v398_v2  ;;  %v1832_v5 = vpop.f32.mrb[12].mxu0  ;;  %v1918_v2 = vmul.f32 %v1774_v33, %v1766_v21  ;;  %v1942_v21 = vmul.f32 %v1774_v33, %v1762_v19 }
 0x142   :  { %1449 = vmatprep.subr.bf16.mxu1 %v399_v1  ;;  %v1834_v8 = vpop.f32.mrb[13].mxu0 }
 0x143   :  { %v1836_v11 = vpop.f32.mrb[14].mxu0  ;;  %2334 = vst [vmem:[#allocation18_spill] sm:$0xff] %v1942_v21  ;;  %v335_v21 = vmul.f32 %v1812_v57, %v1780_v36 }
 0x144   :  { %v1838_v12 = vpop.f32.mrb[15].mxu0  ;;  %v401_v16 = vpack.c.bf16 %v1836_v11, %v1832_v5 }
 0x145   :  { %1450 = vmatpush3.bf16.msra.mxu1 %v399_v1  ;;  %v400_v20 = vpack.c.bf16 %v1838_v12, %v1834_v8  ;;  %v1914_v1 = vmul.f32 %v1776_v34, %v1752_v14  ;;  %v1934_v14 = vmul.f32 %v1774_v33, %v1768_v22  ;;  %v332_v22 = vmul.f32 %v1780_v36, %v1810_v56 }
 0x146   :  { %v267_v33 = vmul.f32 %v1812_v57, %v1778_v35 }
 0x147   :  { %1451 = vmatprep.subr.bf16.mxu1 %v400_v20  ;;  %2332 = vst [vmem:[#allocation16_spill] sm:$0xff] %v1934_v14 }
 0x149   :  { %1452 = vmatpush3.bf16.msra.mxu1 %v400_v20  ;;  %v1945_v20 = vstv %s1850_s24 }
 0x14a   :  { %1453 = vmatprep.subr.bf16.mxu1 %v401_v16 }
 0x14d   :  { %1454 = vmatpush3.bf16.msra.mxu1 %v401_v16  ;;  %v1930_v16 = vmul.f32 %v1776_v34, %v1760_v18  ;;  %v279_v18 = vadd.f32 %v263_v52, %v245_v37 }
 0x14f   :  { %2331 = vst [vmem:[#allocation15_spill] sm:$0xff] %v1930_v16 }
 0x150   :  { %1456 = vmatmul.mubr.bf16.vlgmr.msra.gmra.mrb[0].mxu1 %v1552_v23  ;;  %v1948_v23 = vstv %s1852_s25 }
 0x151   :  { %1459 = vmatprep.mubr.bf16.mxu1 %v1553_v24  ;;  %v278_v24 = vadd.f32 %v262_v51, %v244_v31 }
 0x158   :  { %1460 = vmatmul.mubr.bf16.gmra.mrb[4].mxu1 %v1554_v25  ;;  %v346_v25 = vadd.f32 %v330_v13, %v312_v32 }
 0x159   :  { %1463 = vmatprep.mubr.bf16.mxu1 %v1555_v26  ;;  %v347_v26 = vadd.f32 %v331_v59, %v313_v38  ;;  %v265_v38 = vmul.f32 %v1778_v35, %v1814_v58 }
 0x160   :  { %1464 = vmatmul.mubr.bf16.gmra.mrb[8].mxu1 %v1556_v27  ;;  %v282_v27 = vadd.f32 %v266_v17, %v248_v40  ;;  %v333_v40 = vmul.f32 %v1780_v36, %v1814_v58 }
 0x161   :  { %1467 = vmatprep.mubr.bf16.mxu1 %v1557_v28  ;;  %v350_v28 = vadd.f32 %v334_v60, %v316_v41 }
 0x168   :  { %1468 = vmatmul.mubr.bf16.gmra.mrb[12].mxu1 %v1558_v29  ;;  %v264_v29 = vmul.f32 %v1778_v35, %v1810_v56 }
 0x223   :  { %v1457_v30 = vpop.f32.mrb[0].mxu1 }
 0x224   :  { %v567_v31 = vmul.f32 %v1457_v30, %v1945_v20  ;;  %v633_v32 = vmul.f32 %v1457_v30, %v1948_v23  ;;  %v484_v37 = vpop.f32.mrb[1].mxu1 }
 0x225   :  { %v565_v56 = vmul.f32 %v1945_v20, %v484_v37  ;;  %v631_v41 = vmul.f32 %v1948_v23, %v484_v37  ;;  %v1458_v51 = vpop.f32.mrb[2].mxu1 }
 0x226   :  { %v1966_v13 = vadd.f32 %v567_v31, %v278_v24  ;;  %v1968_v52 = vadd.f32 %v633_v32, %v346_v25  ;;  %v568_v57 = vmul.f32 %v1458_v51, %v1945_v20  ;;  %v634_v59 = vmul.f32 %v1458_v51, %v1948_v23  ;;  %v487_v17 = vpop.f32.mrb[3].mxu1 }
 0x227   :  { %v1973_v60 = vadd.f32 %v565_v56, %v1796_v47  ;;  %v1976_v55 = vadd.f32 %v631_v41, %v1798_v48  ;;  %v697_v58 = vpack.c.bf16 %v1458_v51, %v1457_v30  ;;  %v566_v14 = vmul.f32 %v1945_v20, %v487_v17 }
 0x228   :  { %2335 = vst [vmem:[#allocation19_spill] sm:$0xff] %v1966_v13  ;;  %2336 = vst [vmem:[#allocation20_spill] sm:$0xff] %v1968_v52  ;;  %v1979_v16 = vadd.f32 %v568_v57, %v279_v18  ;;  %v1981_v24 = vadd.f32 %v634_v59, %v347_v26  ;;  %v632_v25 = vmul.f32 %v1948_v23, %v487_v17 }
 0x229   :  { %v696_v31 = vpack.c.bf16 %v487_v17, %v484_v37  ;;  %v280_v32 = vadd.f32 %v264_v29, %v246_v42  ;;  %v348_v52 = vadd.f32 %v332_v22, %v314_v3  ;;  %v283_v13 = vadd.f32 %v267_v33, %v249_v43 }
 0x22a   :  { %v1985_v44 = vadd.f32 %v566_v14, %v1804_v53  ;;  %v351_v47 = vadd.f32 %v335_v21, %v317_v45  ;;  %v281_v56 = vadd.f32 %v265_v38, %v247_v4  ;;  %v349_v48 = vadd.f32 %v333_v40, %v315_v46 }
 0x22b   :  { %v1988_v30 = vadd.f32 %v632_v25, %v1806_v54  ;;  %1471 = vmatprep.subr.bf16.mxu0 %v696_v31  ;;  %v270_v18 = vmul.f32 %v1820_v61, %v1778_v35  ;;  %v338_v26 = vmul.f32 %v1820_v61, %v1780_v36  ;;  %v268_v42 = vmul.f32 %v1778_v35, %v1822_v62  ;;  %v1461_v3 = vpop.f32.mrb[4].mxu1 }
 0x22c   :  { %v336_v53 = vmul.f32 %v1780_v36, %v1822_v62  ;;  %1472 = vmatpush3.bf16.msra.mxu0 %v696_v31  ;;  %v271_v43 = vmul.f32 %v1824_v63, %v1778_v35  ;;  %v339_v54 = vmul.f32 %v1824_v63, %v1780_v36  ;;  %v571_v45 = vmul.f32 %v1461_v3, %v1945_v20  ;;  %v500_v61 = vpop.f32.mrb[5].mxu1 }
 0x22d   :  { %v637_v4 = vmul.f32 %v1461_v3, %v1948_v23  ;;  %1473 = vmatprep.subr.bf16.mxu0 %v697_v58  ;;  %v269_v46 = vmul.f32 %v1778_v35, %v1826_v0  ;;  %v337_v62 = vmul.f32 %v1780_v36, %v1826_v0  ;;  %v569_v14 = vmul.f32 %v1945_v20, %v500_v61  ;;  %v1462_v29 = vpop.f32.mrb[6].mxu1 }
 0x22e   :  { %v635_v21 = vmul.f32 %v1948_v23, %v500_v61  ;;  %v2010_v22 = vadd.f32 %v571_v45, %v282_v27  ;;  %v572_v33 = vmul.f32 %v1462_v29, %v1945_v20  ;;  %v638_v37 = vmul.f32 %v1462_v29, %v1948_v23  ;;  %v503_v38 = vpop.f32.mrb[7].mxu1 }
 0x22f   :  { %v2012_v63 = vadd.f32 %v637_v4, %v350_v28  ;;  %v2016_v40 = vadd.f32 %v569_v14, %v280_v32  ;;  %v699_v51 = vpack.c.bf16 %v1462_v29, %v1461_v3  ;;  %v570_v0 = vmul.f32 %v1945_v20, %v503_v38 }
 0x230   :  { %v2018_v41 = vadd.f32 %v635_v21, %v348_v52  ;;  %1474 = vmatpush3.bf16.msra.mxu0 %v697_v58  ;;  %v2021_v57 = vadd.f32 %v572_v33, %v283_v13  ;;  %v2023_v59 = vadd.f32 %v638_v37, %v351_v47  ;;  %v636_v27 = vmul.f32 %v1948_v23, %v503_v38 }
 0x231   :  { %v698_v28 = vpack.c.bf16 %v503_v38, %v500_v61  ;;  %v286_v17 = vadd.f32 %v270_v18, %v1874_v9  ;;  %v354_v25 = vadd.f32 %v338_v26, %v1878_v49  ;;  %v284_v31 = vadd.f32 %v268_v42, %v1882_v6 }
 0x232   :  { %v2029_v32 = vadd.f32 %v570_v0, %v281_v56  ;;  %v352_v52 = vadd.f32 %v336_v53, %v1886_v10  ;;  %v287_v3 = vadd.f32 %v271_v43, %v1890_v50  ;;  %v355_v13 = vadd.f32 %v339_v54, %v1894_v7 }
 0x233   :  { %v2034_v58 = vadd.f32 %v636_v27, %v349_v48  ;;  %1475 = vmatprep.subr.bf16.mxu0 %v698_v28  ;;  %v285_v47 = vadd.f32 %v269_v46, %v1898_v15  ;;  %v353_v45 = vadd.f32 %v337_v62, %v1914_v1  ;;  %v274_v9 = vmul.f32 %v1832_v5, %v1778_v35  ;;  %v1465_v6 = vpop.f32.mrb[8].mxu1 }
 0x234   :  { %v342_v49 = vmul.f32 %v1832_v5, %v1780_v36  ;;  %1476 = vmatpush3.bf16.msra.mxu0 %v698_v28  ;;  %v272_v10 = vmul.f32 %v1778_v35, %v1834_v8  ;;  %v340_v50 = vmul.f32 %v1780_v36, %v1834_v8  ;;  %v575_v7 = vmul.f32 %v1465_v6, %v1945_v20  ;;  %v516_v1 = vpop.f32.mrb[9].mxu1 }
 0x235   :  { %v641_v15 = vmul.f32 %v1465_v6, %v1948_v23  ;;  %1477 = vmatprep.subr.bf16.mxu0 %v699_v51  ;;  %v275_v56 = vmul.f32 %v1836_v11, %v1778_v35  ;;  %v343_v5 = vmul.f32 %v1836_v11, %v1780_v36  ;;  %v573_v48 = vmul.f32 %v1945_v20, %v516_v1  ;;  %v1466_v26 = vpop.f32.mrb[10].mxu1 }
 0x236   :  { %v639_v18 = vmul.f32 %v1948_v23, %v516_v1  ;;  %v2054_v42 = vadd.f32 %v575_v7, %v286_v17  ;;  %v576_v53 = vmul.f32 %v1466_v26, %v1945_v20  ;;  %v642_v43 = vmul.f32 %v1466_v26, %v1948_v23  ;;  %v519_v54 = vpop.f32.mrb[11].mxu1  ;;  %v2337_v17 = vld [vmem:[#allocation14_spill] sm:$0xff] }
 0x237   :  { %v2056_v8 = vadd.f32 %v641_v15, %v354_v25  ;;  %v2060_v4 = vadd.f32 %v573_v48, %v284_v31  ;;  %v701_v46 = vpack.c.bf16 %v1466_v26, %v1465_v6  ;;  %v574_v11 = vmul.f32 %v1945_v20, %v519_v54  ;;  %v2338_v31 = vld [vmem:[#allocation15_spill] sm:$0xff] }
 0x238   :  { %v2062_v61 = vadd.f32 %v639_v18, %v352_v52  ;;  %1478 = vmatpush3.bf16.msra.mxu0 %v699_v51  ;;  %v2065_v62 = vadd.f32 %v576_v53, %v287_v3  ;;  %v2067_v14 = vadd.f32 %v642_v43, %v355_v13  ;;  %v640_v21 = vmul.f32 %v1948_v23, %v519_v54  ;;  %v2339_v3 = vld [vmem:[#allocation16_spill] sm:$0xff] }
 0x239   :  { %v700_v29 = vpack.c.bf16 %v519_v54, %v516_v1  ;;  %v273_v33 = vmul.f32 %v1778_v35, %v1838_v12  ;;  %v323_v37 = vmul.f32 %v1776_v34, %v1762_v19  ;;  %v341_v38 = vmul.f32 %v1780_v36, %v1838_v12  ;;  %v2340_v34 = vld [vmem:[#allocation17_spill] sm:$0xff] }
 0x23a   :  { %v2076_v0 = vadd.f32 %v574_v11, %v285_v47  ;;  %v2078_v27 = vadd.f32 %v640_v21, %v353_v45  ;;  %v290_v51 = vadd.f32 %v274_v9, %v1918_v2  ;;  %v358_v28 = vadd.f32 %v342_v49, %v1922_v39  ;;  %v2341_v45 = vld [vmem:[#allocation18_spill] sm:$0xff] }
 0x23b   :  { %1479 = vmatprep.subr.bf16.mxu0 %v700_v29  ;;  %v288_v25 = vadd.f32 %v272_v10, %v2337_v17  ;;  %v356_v52 = vadd.f32 %v340_v50, %v2338_v31  ;;  %v1469_v35 = vpop.f32.mrb[12].mxu1  ;;  %v291_v19 = vadd.f32 %v275_v56, %v2339_v3  ;;  %v359_v13 = vadd.f32 %v343_v5, %v2340_v34 }
 0x23c   :  { %1480 = vmatpush3.bf16.msra.mxu0 %v700_v29  ;;  %v579_v36 = vmul.f32 %v1469_v35, %v1945_v20  ;;  %v645_v12 = vmul.f32 %v1469_v35, %v1948_v23  ;;  %v532_v47 = vpop.f32.mrb[13].mxu1  ;;  %v289_v2 = vadd.f32 %v273_v33, %v2341_v45  ;;  %v357_v9 = vadd.f32 %v341_v38, %v323_v37  ;;  %v1560_v29 = vld [vmem:[#allocation6 + $0x88] sm:$0xff]   ;;  %v1561_v33 = vld [vmem:[#allocation6 + $0x90] sm:$0xff]  }
 0x23d   :  { %1481 = vmatprep.subr.bf16.mxu0 %v701_v46  ;;  %v577_v39 = vmul.f32 %v1945_v20, %v532_v47  ;;  %v643_v49 = vmul.f32 %v1948_v23, %v532_v47  ;;  %v1470_v6 = vpop.f32.mrb[14].mxu1  ;;  %v1564_v37 = vld [vmem:[#allocation6 + $0xa8] sm:$0xff]   ;;  %v1565_v38 = vld [vmem:[#allocation6 + $0xb0] sm:$0xff]   ;;  %v2113_v17 = vstv %s1332_s27 }
 0x23e   :  { %v2091_v10 = vadd.f32 %v579_v36, %v290_v51  ;;  %v2093_v50 = vadd.f32 %v645_v12, %v358_v28  ;;  %v580_v7 = vmul.f32 %v1470_v6, %v1945_v20  ;;  %v646_v15 = vmul.f32 %v1470_v6, %v1948_v23  ;;  %v535_v1 = vpop.f32.mrb[15].mxu1  ;;  %v1567_v51 = vld [vmem:[#allocation6 + $0xc0] sm:$0xff]   ;;  %v2343_v12 = vld [vmem:[#allocation20_spill] sm:$0xff] }
 0x23f   :  { %v2097_v56 = vadd.f32 %v577_v39, %v288_v25  ;;  %v2099_v5 = vadd.f32 %v643_v49, %v356_v52  ;;  %v703_v48 = vpack.c.bf16 %v1470_v6, %v1469_v35  ;;  %v578_v18 = vmul.f32 %v1945_v20, %v535_v1  ;;  %v1562_v20 = vld [vmem:[#allocation6 + $0x98] sm:$0xff]   ;;  %1519 = vmatprep.mubr.bf16.mxu1 %v1567_v51 }
 0x240   :  { %1482 = vmatpush3.bf16.msra.mxu0 %v701_v46  ;;  %v2102_v26 = vadd.f32 %v580_v7, %v291_v19  ;;  %v2104_v53 = vadd.f32 %v646_v15, %v359_v13  ;;  %v644_v43 = vmul.f32 %v1948_v23, %v535_v1  ;;  %v702_v54 = vpack.c.bf16 %v535_v1, %v532_v47  ;;  %v1563_v46 = vld [vmem:[#allocation6 + $0xa0] sm:$0xff]   ;;  %v1566_v23 = vld [vmem:[#allocation6 + $0xb8] sm:$0xff]   ;;  %v2342_v13 = vld [vmem:[#allocation19_spill] sm:$0xff] }
 0x241   :  { %v2107_v11 = vadd.f32 %v578_v18, %v289_v2  ;;  %v2111_v28 = vstv %s1331_s26 }
 0x242   :  { %v2109_v21 = vadd.f32 %v644_v43, %v357_v9  ;;  %1483 = vmatprep.subr.bf16.mxu0 %v702_v54 }
 0x244   :  { %1484 = vmatpush3.bf16.msra.mxu0 %v702_v54 }
 0x245   :  { %1485 = vmatprep.subr.bf16.mxu0 %v703_v48 }
 0x248   :  { %1486 = vmatpush3.bf16.msra.mxu0 %v703_v48 }
 0x24b   :  { %1488 = vmatmul.mubr.bf16.vlgmr.msra.gmra.mrb[16].mxu0 %v1560_v29 }
 0x24c   :  { %1491 = vmatprep.mubr.bf16.mxu0 %v1561_v33 }
 0x253   :  { %1492 = vmatmul.mubr.bf16.gmra.mrb[20].mxu0 %v1562_v20 }
 0x254   :  { %1495 = vmatprep.mubr.bf16.mxu0 %v1563_v46 }
 0x25b   :  { %1496 = vmatmul.mubr.bf16.gmra.mrb[24].mxu0 %v1564_v37 }
 0x25c   :  { %1499 = vmatprep.mubr.bf16.mxu0 %v1565_v38 }
 0x263   :  { %1500 = vmatmul.mubr.bf16.gmra.mrb[28].mxu0 %v1566_v23 }
 0x31e   :  { %v1489_v25 = vpop.f32.mrb[16].mxu0 }
 0x31f   :  { %v869_v31 = vmul.f32 %v1489_v25, %v2111_v28  ;;  %v935_v52 = vmul.f32 %v1489_v25, %v2113_v17  ;;  %v786_v35 = vpop.f32.mrb[17].mxu0 }
 0x320   :  { %v867_v3 = vmul.f32 %v2111_v28, %v786_v35  ;;  %v933_v19 = vmul.f32 %v2113_v17, %v786_v35  ;;  %v1490_v34 = vpop.f32.mrb[18].mxu0 }
 0x321   :  { %v2120_v36 = vadd.f32 %v869_v31, %v2342_v13  ;;  %v2123_v47 = vadd.f32 %v935_v52, %v2343_v12  ;;  %v870_v45 = vmul.f32 %v1490_v34, %v2111_v28  ;;  %v936_v2 = vmul.f32 %v1490_v34, %v2113_v17  ;;  %v789_v9 = vpop.f32.mrb[19].mxu0 }
 0x322   :  { %v2128_v39 = vadd.f32 %v867_v3, %v1973_v60  ;;  %v2131_v49 = vadd.f32 %v933_v19, %v1976_v55  ;;  %v999_v6 = vpack.c.bf16 %v1490_v34, %v1489_v25  ;;  %v868_v7 = vmul.f32 %v2111_v28, %v789_v9 }
 0x323   :  { %v2135_v15 = vadd.f32 %v870_v45, %v1979_v16  ;;  %v2138_v1 = vadd.f32 %v936_v2, %v1981_v24  ;;  %v934_v48 = vmul.f32 %v2113_v17, %v789_v9  ;;  %v998_v18 = vpack.c.bf16 %v789_v9, %v786_v35 }
 0x324   :  { %v2142_v43 = vadd.f32 %v868_v7, %v1985_v44 }
 0x325   :  { %v2145_v60 = vadd.f32 %v934_v48, %v1988_v30  ;;  %1503 = vmatprep.subr.bf16.mxu1 %v998_v18 }
 0x326   :  { %1504 = vmatpush3.bf16.msra.mxu1 %v998_v18  ;;  %v1493_v55 = vpop.f32.mrb[20].mxu0 }
 0x327   :  { %v873_v54 = vmul.f32 %v1493_v55, %v2111_v28  ;;  %v939_v16 = vmul.f32 %v1493_v55, %v2113_v17  ;;  %1505 = vmatprep.subr.bf16.mxu1 %v999_v6  ;;  %v802_v29 = vpop.f32.mrb[21].mxu0 }
 0x328   :  { %v871_v24 = vmul.f32 %v2111_v28, %v802_v29  ;;  %v937_v33 = vmul.f32 %v2113_v17, %v802_v29  ;;  %v1494_v20 = vpop.f32.mrb[22].mxu0 }
 0x329   :  { %v2152_v44 = vadd.f32 %v873_v54, %v2010_v22  ;;  %v2155_v30 = vadd.f32 %v939_v16, %v2012_v63  ;;  %v874_v46 = vmul.f32 %v1494_v20, %v2111_v28  ;;  %v940_v37 = vmul.f32 %v1494_v20, %v2113_v17  ;;  %v805_v38 = vpop.f32.mrb[23].mxu0 }
 0x32a   :  { %v2160_v23 = vadd.f32 %v871_v24, %v2016_v40  ;;  %v2163_v51 = vadd.f32 %v937_v33, %v2018_v41  ;;  %v1001_v25 = vpack.c.bf16 %v1494_v20, %v1493_v55  ;;  %v872_v31 = vmul.f32 %v2111_v28, %v805_v38  ;;  %1506 = vmatpush3.bf16.msra.mxu1 %v999_v6 }
 0x32b   :  { %v2167_v22 = vadd.f32 %v874_v46, %v2021_v57  ;;  %v2170_v63 = vadd.f32 %v940_v37, %v2023_v59  ;;  %v938_v52 = vmul.f32 %v2113_v17, %v805_v38  ;;  %v1000_v35 = vpack.c.bf16 %v805_v38, %v802_v29 }
 0x32c   :  { %v2174_v3 = vadd.f32 %v872_v31, %v2029_v32 }
 0x32d   :  { %v2177_v40 = vadd.f32 %v938_v52, %v2034_v58  ;;  %1507 = vmatprep.subr.bf16.mxu1 %v1000_v35 }
 0x32e   :  { %1508 = vmatpush3.bf16.msra.mxu1 %v1000_v35  ;;  %v1497_v41 = vpop.f32.mrb[24].mxu0 }
 0x32f   :  { %v877_v19 = vmul.f32 %v1497_v41, %v2111_v28  ;;  %v943_v57 = vmul.f32 %v1497_v41, %v2113_v17  ;;  %1509 = vmatprep.subr.bf16.mxu1 %v1001_v25  ;;  %v818_v34 = vpop.f32.mrb[25].mxu0 }
 0x330   :  { %v875_v59 = vmul.f32 %v2111_v28, %v818_v34  ;;  %v941_v13 = vmul.f32 %v2113_v17, %v818_v34  ;;  %v1498_v12 = vpop.f32.mrb[26].mxu0 }
 0x331   :  { %v2184_v32 = vadd.f32 %v877_v19, %v2054_v42  ;;  %v2187_v58 = vadd.f32 %v943_v57, %v2056_v8  ;;  %v878_v45 = vmul.f32 %v1498_v12, %v2111_v28  ;;  %v944_v2 = vmul.f32 %v1498_v12, %v2113_v17  ;;  %v821_v9 = vpop.f32.mrb[27].mxu0 }
 0x332   :  { %v2192_v6 = vadd.f32 %v875_v59, %v2060_v4  ;;  %v2195_v7 = vadd.f32 %v941_v13, %v2062_v61  ;;  %v1003_v48 = vpack.c.bf16 %v1498_v12, %v1497_v41  ;;  %v876_v18 = vmul.f32 %v2111_v28, %v821_v9  ;;  %1510 = vmatpush3.bf16.msra.mxu1 %v1001_v25 }
 0x333   :  { %v2199_v42 = vadd.f32 %v878_v45, %v2065_v62  ;;  %v2202_v8 = vadd.f32 %v944_v2, %v2067_v14  ;;  %v942_v55 = vmul.f32 %v2113_v17, %v821_v9  ;;  %v1002_v54 = vpack.c.bf16 %v821_v9, %v818_v34  ;;  %v1573_v34 = vld [vmem:[#allocation6 + $0xf0] sm:$0xff]  }
 0x334   :  { %v2206_v16 = vadd.f32 %v876_v18, %v2076_v0  ;;  %v2245_v59 = vstv %s1342_s29 }
 0x335   :  { %v2209_v4 = vadd.f32 %v942_v55, %v2078_v27  ;;  %1511 = vmatprep.subr.bf16.mxu1 %v1002_v54 }
 0x336   :  { %1512 = vmatpush3.bf16.msra.mxu1 %v1002_v54  ;;  %v1501_v61 = vpop.f32.mrb[28].mxu0 }
 0x337   :  { %v881_v29 = vmul.f32 %v1501_v61, %v2111_v28  ;;  %v947_v62 = vmul.f32 %v1501_v61, %v2113_v17  ;;  %1513 = vmatprep.subr.bf16.mxu1 %v1003_v48  ;;  %v834_v24 = vpop.f32.mrb[29].mxu0 }
 0x338   :  { %v879_v14 = vmul.f32 %v2111_v28, %v834_v24  ;;  %v945_v33 = vmul.f32 %v2113_v17, %v834_v24  ;;  %v1502_v20 = vpop.f32.mrb[30].mxu0 }
 0x339   :  { %v2216_v0 = vadd.f32 %v881_v29, %v2091_v10  ;;  %v2219_v27 = vadd.f32 %v947_v62, %v2093_v50  ;;  %v882_v46 = vmul.f32 %v1502_v20, %v2111_v28  ;;  %v948_v37 = vmul.f32 %v1502_v20, %v2113_v17  ;;  %v837_v38 = vpop.f32.mrb[31].mxu0 }
 0x33a   :  { %v2224_v25 = vadd.f32 %v879_v14, %v2097_v56  ;;  %v2227_v31 = vadd.f32 %v945_v33, %v2099_v5  ;;  %v1005_v52 = vpack.c.bf16 %v1502_v20, %v1501_v61  ;;  %v880_v35 = vmul.f32 %v2111_v28, %v837_v38  ;;  %1514 = vmatpush3.bf16.msra.mxu1 %v1003_v48  ;;  %v1568_v5 = vld [vmem:[#allocation6 + $0xc8] sm:$0xff]   ;;  %v1569_v28 = vld [vmem:[#allocation6 + $0xd0] sm:$0xff]  }
 0x33b   :  { %v2231_v10 = vadd.f32 %v882_v46, %v2102_v26  ;;  %v2234_v50 = vadd.f32 %v948_v37, %v2104_v53  ;;  %v946_v41 = vmul.f32 %v2113_v17, %v837_v38  ;;  %v1004_v19 = vpack.c.bf16 %v837_v38, %v834_v24  ;;  %v1570_v26 = vld [vmem:[#allocation6 + $0xd8] sm:$0xff]   ;;  %v1571_v53 = vld [vmem:[#allocation6 + $0xe0] sm:$0xff]   ;;  %v1572_v17 = vld [vmem:[#allocation6 + $0xe8] sm:$0xff]  }
 0x33c   :  { %v2238_v57 = vadd.f32 %v880_v35, %v2107_v11  ;;  %v1574_v11 = vld [vmem:[#allocation6 + $0xf8] sm:$0xff]  }
 0x33d   :  { %v2241_v56 = vadd.f32 %v946_v41, %v2109_v21  ;;  %1515 = vmatprep.subr.bf16.mxu1 %v1004_v19  ;;  %v2243_v21 = vstv %s1341_s28 }
 0x33e   :  { %1516 = vmatpush3.bf16.msra.mxu1 %v1004_v19 }
 0x33f   :  { %1517 = vmatprep.subr.bf16.mxu1 %v1005_v52 }
 0x342   :  { %1518 = vmatpush3.bf16.msra.mxu1 %v1005_v52 }
 0x345   :  { %1520 = vmatmul.mubr.bf16.vlgmr.msra.gmra.mrb[16].mxu1 %v1568_v5 }
 0x346   :  { %1523 = vmatprep.mubr.bf16.mxu1 %v1569_v28 }
 0x34d   :  { %1524 = vmatmul.mubr.bf16.gmra.mrb[20].mxu1 %v1570_v26 }
 0x34e   :  { %1527 = vmatprep.mubr.bf16.mxu1 %v1571_v53 }
 0x355   :  { %1528 = vmatmul.mubr.bf16.gmra.mrb[24].mxu1 %v1572_v17 }
 0x356   :  { %1531 = vmatprep.mubr.bf16.mxu1 %v1573_v34 }
 0x35d   :  { %1532 = vmatmul.mubr.bf16.gmra.mrb[28].mxu1 %v1574_v11 }
 0x418   :  { %v1521_v13 = vpop.f32.mrb[16].mxu1 }
 0x419   :  { %v1171_v12 = vmul.f32 %v1521_v13, %v2243_v21  ;;  %v1237_v45 = vmul.f32 %v1521_v13, %v2245_v59  ;;  %v1088_v2 = vpop.f32.mrb[17].mxu1 }
 0x41a   :  { %v1169_v9 = vmul.f32 %v2243_v21, %v1088_v2  ;;  %v1235_v48 = vmul.f32 %v2245_v59, %v1088_v2  ;;  %v1522_v18 = vpop.f32.mrb[18].mxu1 }
 0x41b   :  { %v1187_v55 = vadd.f32 %v1171_v12, %v2120_v36  ;;  %v1253_v54 = vadd.f32 %v1237_v45, %v2123_v47  ;;  %v1172_v61 = vmul.f32 %v1522_v18, %v2243_v21  ;;  %v1238_v29 = vmul.f32 %v1522_v18, %v2245_v59  ;;  %v1091_v62 = vpop.f32.mrb[19].mxu1 }
 0x41c   :  { %v1185_v24 = vadd.f32 %v1169_v9, %v2128_v39  ;;  %v1251_v14 = vadd.f32 %v1235_v48, %v2131_v49  ;;  %v1170_v33 = vmul.f32 %v2243_v21, %v1091_v62  ;;  %v1236_v20 = vmul.f32 %v2245_v59, %v1091_v62 }
 0x41d   :  { %1203 = vst [vmem:[#allocation9 + $0x10] sm:$0xff] %v1187_v55  ;;  %1269 = vst [vmem:[#allocation9 + $0x90] sm:$0xff] %v1253_v54  ;;  %v1188_v46 = vadd.f32 %v1172_v61, %v2135_v15  ;;  %v1254_v36 = vadd.f32 %v1238_v29, %v2138_v1 }
 0x41e   :  { %1201 = vst [vmem:[#allocation9] sm:$0xff] %v1185_v24  ;;  %1267 = vst [vmem:[#allocation9 + $0x80] sm:$0xff] %v1251_v14  ;;  %v1186_v47 = vadd.f32 %v1170_v33, %v2142_v43  ;;  %v1252_v37 = vadd.f32 %v1236_v20, %v2145_v60 }
 0x41f   :  { %1204 = vst [vmem:[#allocation9 + $0x18] sm:$0xff] %v1188_v46  ;;  %1270 = vst [vmem:[#allocation9 + $0x98] sm:$0xff] %v1254_v36 }
 0x420   :  { %1202 = vst [vmem:[#allocation9 + $0x8] sm:$0xff] %v1186_v47  ;;  %1268 = vst [vmem:[#allocation9 + $0x88] sm:$0xff] %v1252_v37  ;;  %v1525_v39 = vpop.f32.mrb[20].mxu1 }
 0x421   :  { %v1175_v49 = vmul.f32 %v1525_v39, %v2243_v21  ;;  %v1241_v38 = vmul.f32 %v1525_v39, %v2245_v59  ;;  %v1104_v52 = vpop.f32.mrb[21].mxu1 }
 0x422   :  { %v1173_v15 = vmul.f32 %v2243_v21, %v1104_v52  ;;  %v1239_v1 = vmul.f32 %v2245_v59, %v1104_v52  ;;  %v1526_v35 = vpop.f32.mrb[22].mxu1 }
 0x423   :  { %v1191_v41 = vadd.f32 %v1175_v49, %v2152_v44  ;;  %v1257_v43 = vadd.f32 %v1241_v38, %v2155_v30  ;;  %v1176_v60 = vmul.f32 %v1526_v35, %v2243_v21  ;;  %v1242_v19 = vmul.f32 %v1526_v35, %v2245_v59  ;;  %v1107_v5 = vpop.f32.mrb[23].mxu1 }
 0x424   :  { %v1189_v28 = vadd.f32 %v1173_v15, %v2160_v23  ;;  %v1255_v26 = vadd.f32 %v1239_v1, %v2163_v51  ;;  %v1174_v53 = vmul.f32 %v2243_v21, %v1107_v5  ;;  %v1240_v17 = vmul.f32 %v2245_v59, %v1107_v5 }
 0x425   :  { %1207 = vst [vmem:[#allocation9 + $0x30] sm:$0xff] %v1191_v41  ;;  %1273 = vst [vmem:[#allocation9 + $0xb0] sm:$0xff] %v1257_v43  ;;  %v1192_v34 = vadd.f32 %v1176_v60, %v2167_v22  ;;  %v1258_v44 = vadd.f32 %v1242_v19, %v2170_v63 }
 0x426   :  { %1205 = vst [vmem:[#allocation9 + $0x20] sm:$0xff] %v1189_v28  ;;  %1271 = vst [vmem:[#allocation9 + $0xa0] sm:$0xff] %v1255_v26  ;;  %v1190_v30 = vadd.f32 %v1174_v53, %v2174_v3  ;;  %v1256_v11 = vadd.f32 %v1240_v17, %v2177_v40 }
 0x427   :  { %1208 = vst [vmem:[#allocation9 + $0x38] sm:$0xff] %v1192_v34  ;;  %1274 = vst [vmem:[#allocation9 + $0xb8] sm:$0xff] %v1258_v44 }
 0x428   :  { %1206 = vst [vmem:[#allocation9 + $0x28] sm:$0xff] %v1190_v30  ;;  %1272 = vst [vmem:[#allocation9 + $0xa8] sm:$0xff] %v1256_v11  ;;  %v1529_v23 = vpop.f32.mrb[24].mxu1 }
 0x429   :  { %v1179_v51 = vmul.f32 %v1529_v23, %v2243_v21  ;;  %v1245_v13 = vmul.f32 %v1529_v23, %v2245_v59  ;;  %v1120_v12 = vpop.f32.mrb[25].mxu1 }
 0x42a   :  { %v1177_v22 = vmul.f32 %v2243_v21, %v1120_v12  ;;  %v1243_v63 = vmul.f32 %v2245_v59, %v1120_v12  ;;  %v1530_v45 = vpop.f32.mrb[26].mxu1 }
 0x42b   :  { %v1195_v2 = vadd.f32 %v1179_v51, %v2184_v32  ;;  %v1261_v3 = vadd.f32 %v1245_v13, %v2187_v58  ;;  %v1180_v40 = vmul.f32 %v1530_v45, %v2243_v21  ;;  %v1246_v9 = vmul.f32 %v1530_v45, %v2245_v59  ;;  %v1123_v48 = vpop.f32.mrb[27].mxu1 }
 0x42c   :  { %v1193_v18 = vadd.f32 %v1177_v22, %v2192_v6  ;;  %v1259_v55 = vadd.f32 %v1243_v63, %v2195_v7  ;;  %v1178_v54 = vmul.f32 %v2243_v21, %v1123_v48  ;;  %v1244_v61 = vmul.f32 %v2245_v59, %v1123_v48 }
 0x42d   :  { %1211 = vst [vmem:[#allocation9 + $0x50] sm:$0xff] %v1195_v2  ;;  %1277 = vst [vmem:[#allocation9 + $0xd0] sm:$0xff] %v1261_v3  ;;  %v1196_v29 = vadd.f32 %v1180_v40, %v2199_v42  ;;  %v1262_v32 = vadd.f32 %v1246_v9, %v2202_v8 }
 0x42e   :  { %1209 = vst [vmem:[#allocation9 + $0x40] sm:$0xff] %v1193_v18  ;;  %1275 = vst [vmem:[#allocation9 + $0xc0] sm:$0xff] %v1259_v55  ;;  %v1194_v58 = vadd.f32 %v1178_v54, %v2206_v16  ;;  %v1260_v62 = vadd.f32 %v1244_v61, %v2209_v4 }
 0x42f   :  { %1212 = vst [vmem:[#allocation9 + $0x58] sm:$0xff] %v1196_v29  ;;  %1278 = vst [vmem:[#allocation9 + $0xd8] sm:$0xff] %v1262_v32 }
 0x430   :  { %1210 = vst [vmem:[#allocation9 + $0x48] sm:$0xff] %v1194_v58  ;;  %1276 = vst [vmem:[#allocation9 + $0xc8] sm:$0xff] %v1260_v62  ;;  %v1533_v6 = vpop.f32.mrb[28].mxu1 }
 0x431   :  { %v1183_v7 = vmul.f32 %v1533_v6, %v2243_v21  ;;  %v1249_v24 = vmul.f32 %v1533_v6, %v2245_v59  ;;  %v1136_v14 = vpop.f32.mrb[29].mxu1 }
 0x432   :  { %v1181_v42 = vmul.f32 %v2243_v21, %v1136_v14  ;;  %v1247_v8 = vmul.f32 %v2245_v59, %v1136_v14  ;;  %v1534_v33 = vpop.f32.mrb[30].mxu1 }
 0x433   :  { %v1199_v20 = vadd.f32 %v1183_v7, %v2216_v0  ;;  %v1265_v16 = vadd.f32 %v1249_v24, %v2219_v27  ;;  %v1184_v4 = vmul.f32 %v1534_v33, %v2243_v21  ;;  %v1250_v46 = vmul.f32 %v1534_v33, %v2245_v59  ;;  %v1139_v36 = vpop.f32.mrb[31].mxu1 }
 0x434   :  { %v1197_v47 = vadd.f32 %v1181_v42, %v2224_v25  ;;  %v1263_v37 = vadd.f32 %v1247_v8, %v2227_v31  ;;  %v1182_v39 = vmul.f32 %v2243_v21, %v1139_v36  ;;  %v1248_v49 = vmul.f32 %v2245_v59, %v1139_v36 }
 0x435   :  { %1215 = vst [vmem:[#allocation9 + $0x70] sm:$0xff] %v1199_v20  ;;  %1281 = vst [vmem:[#allocation9 + $0xf0] sm:$0xff] %v1265_v16  ;;  %v1200_v0 = vadd.f32 %v1184_v4, %v2231_v10  ;;  %v1266_v27 = vadd.f32 %v1250_v46, %v2234_v50 }
 0x436   :  { %1213 = vst [vmem:[#allocation9 + $0x60] sm:$0xff] %v1197_v47  ;;  %1279 = vst [vmem:[#allocation9 + $0xe0] sm:$0xff] %v1263_v37  ;;  %v1198_v38 = vadd.f32 %v1182_v39, %v2238_v57  ;;  %v1264_v52 = vadd.f32 %v1248_v49, %v2241_v56 }
 0x437   :  { %1216 = vst [vmem:[#allocation9 + $0x78] sm:$0xff] %v1200_v0  ;;  %1282 = vst [vmem:[#allocation9 + $0xf8] sm:$0xff] %v1266_v27 }
 0x438   :  { %1214 = vst [vmem:[#allocation9 + $0x68] sm:$0xff] %v1198_v38  ;;  %1280 = vst [vmem:[#allocation9 + $0xe8] sm:$0xff] %v1264_v52 }
 0x439   :  { %1640 = shalt.err (!%p1637_p9)
}
 0x43a   :  { %s1641_s7 = scalar_lea.hbm %s2329_s3, 4096 }
 0x43b   :  { %p1642_p10 = scmp.ne.s32.totalorder %s2329_s3, %s1641_s7  ;;  %p1645_p11 = scmp.lt.u32.totalorder %s1641_s7, %s2329_s3 }
 0x43d   :  { %p1647_p12 = pnand %p1645_p11, %p1642_p10 }
 0x43f   :  { %1650 = shalt.err (!%p1647_p12)
}
 0x440   :  { %1294 = dma.vmem_to_hbm [thread:$0]  %s1289_s4, 4096, %s2329_s3, [#allocation4], %s1664_s1, %s1664_s1, %s1665_s18  }
 0x441   :  { %1657 = dma.done.wait [#allocation4], 4096  }
 0x442   :  { %1658 = vsyncadd [#allocation4], 4294963200 }
 0x443   :  { %1298 = vsyncpa [#allocation3], 1 }
 0x444   :  { %1299 = vsyncpa [#allocation8], 1 }
 0x445   :  { %1300 = vsyncpa [#allocation4], 1 }
 0x446   :  { %1301 = vsyncpa [#allocation5], 1 }

</bundles_post_ra>
